<compile_context>
chip_gen: v7x
topology: tpu7x:2x2x1
jax: 0.10.0
libtpu: 0.0.40
codegen_flags: <defaults>
</compile_context>

<pallas_src>
import jax
import jax.numpy as jnp
import numpy as np
from jax.experimental import pallas as pl
from jax.experimental.pallas import tpu as pltpu


# ---------------------------------------------------------------------------
# Buffer construction (mirrors VisionRotaryEmbeddingFast.__init__, freqs_for='lang')
# ---------------------------------------------------------------------------
def make_rope_buffers(dim, pt_seq_len=16, ft_seq_len=None, theta=10000.0):
    if ft_seq_len is None:
        ft_seq_len = pt_seq_len
    freqs = 1.0 / (theta ** (jnp.arange(0, dim, 2)[: dim // 2].astype(jnp.float32) / dim))
    t = jnp.arange(ft_seq_len).astype(jnp.float32) / ft_seq_len * pt_seq_len
    freqs = jnp.einsum("i,f->if", t, freqs)                  # (ft, dim//2)
    freqs = jnp.repeat(freqs, 2, axis=-1)                    # (ft, dim)  '... n -> ... (n r)'
    a = jnp.broadcast_to(freqs[:, None, :], (ft_seq_len, ft_seq_len, dim))
    b = jnp.broadcast_to(freqs[None, :, :], (ft_seq_len, ft_seq_len, dim))
    f = jnp.concatenate([a, b], axis=-1)                     # (ft, ft, 2*dim)
    freqs_cos = jnp.cos(f).reshape(-1, f.shape[-1])          # (N, D)
    freqs_sin = jnp.sin(f).reshape(-1, f.shape[-1])          # (N, D)
    return freqs_cos, freqs_sin


# ---------------------------------------------------------------------------
# Pallas kernel: out = x*cos + x_left*sin_even + x_right*sin_odd
#   x_left[i]  = x[i+1]   (used only on even lanes, where sin_even = -sin)
#   x_right[i] = x[i-1]   (used only on odd lanes,  where sin_odd  = +sin)
# The circular wrap-around lanes are never selected because the sign/mask is
# baked into the sin tables (zeros on the other parity).
# ---------------------------------------------------------------------------
def rope_kernel(t_ref, cos_ref, sin_e_ref, sin_o_ref, o_ref):
    x = t_ref[...].astype(jnp.float32)          # (TM, R, C)
    tm, r, c = x.shape

    # Do the lane rolls on a 2-D view (positive axis required by pltpu.roll).
    x2 = x.reshape(tm * r, c)
    x_left = pltpu.roll(x2, shift=c - 1, axis=1).reshape(tm, r, c)   # x[i+1] at lane i
    x_right = pltpu.roll(x2, shift=1, axis=1).reshape(tm, r, c)      # x[i-1] at lane i

    cos = cos_ref[...][None, :, :]              # (1, R, C) broadcast over TM
    sin_e = sin_e_ref[...][None, :, :]
    sin_o = sin_o_ref[...][None, :, :]

    out = x * cos + x_left * sin_e + x_right * sin_o
    o_ref[...] = out.astype(o_ref.dtype)


def _largest_divisor_at_most(n, cap):
    cap = max(1, min(n, cap))
    for d in range(cap, 0, -1):
        if n % d == 0:
            return d
    return 1


def vision_rotary_embedding_fast(t, freqs_cos, freqs_sin,
                                 *, target_block_bytes=2 * 1024 * 1024):
    """t: (B, H, N, D); freqs_cos/sin: (N, D)."""
    B, H, N, D = t.shape
    assert D % 2 == 0, "rotate_half requires an even last dim"
    assert freqs_cos.shape == (N, D) and freqs_sin.shape == (N, D)

    M = B * H
    total = N * D
    # Lane-dense re-tiling: present the trailing dims as (R, 128) when possible.
    if total % 128 == 0:
        C = 128
        R = total // 128
    else:
        # TODO(synk): fall back to the native (N, D) layout when N*D is not a
        # multiple of 128; stores are then partially masked but still correct.
        C, R = D, N

    t3 = t.reshape(M, R, C)
    cos2 = freqs_cos.astype(jnp.float32).reshape(R, C)

    # Signed / masked sin tables (parity of the flat index == parity within a
    # pair, since both D and C are even).
    sin_flat = freqs_sin.astype(jnp.float32).reshape(-1)
    parity_odd = (jnp.arange(total, dtype=jnp.int32) & 1).astype(bool)
    sin_e = jnp.where(parity_odd, 0.0, -sin_flat).reshape(R, C)   # even lanes: -sin
    sin_o = jnp.where(parity_odd, sin_flat, 0.0).reshape(R, C)    # odd lanes:  +sin

    # Block sizing: fold B*H rows into ~target_block_bytes blocks (exact tiling).
    itemsize = jnp.dtype(t.dtype).itemsize
    per_m_bytes = R * C * itemsize
    tm_cap = max(1, target_block_bytes // per_m_bytes)
    TM = _largest_divisor_at_most(M, tm_cap)

    out3 = pl.pallas_call(
        rope_kernel,
        out_shape=jax.ShapeDtypeStruct((M, R, C), t.dtype),
        grid=(M // TM,),
        in_specs=[
            pl.BlockSpec((TM, R, C), lambda i: (i, 0, 0)),
            pl.BlockSpec((R, C), lambda i: (0, 0)),   # cos: resident, never re-DMA'd
            pl.BlockSpec((R, C), lambda i: (0, 0)),   # sin_even
            pl.BlockSpec((R, C), lambda i: (0, 0)),   # sin_odd
        ],
        out_specs=pl.BlockSpec((TM, R, C), lambda i: (i, 0, 0)),
        compiler_params=pltpu.CompilerParams(
            dimension_semantics=("parallel",),
            vmem_limit_bytes=32 * 1024 * 1024,
        ),
    )(t3, cos2, sin_e, sin_o)

    return out3.reshape(B, H, N, D)


# ---------------------------------------------------------------------------
# Pure-JAX reference (mirrors the PyTorch forward exactly).
# ---------------------------------------------------------------------------
def _rotate_half_ref(x):
    shape = x.shape
    x = x.reshape(shape[:-1] + (shape[-1] // 2, 2))
    x1, x2 = x[..., 0], x[..., 1]
    out = jnp.stack((-x2, x1), axis=-1)
    return out.reshape(shape)


def _forward_ref(t, cos, sin):
    return t * cos + _rotate_half_ref(t) * sin


if __name__ == "__main__":
    # Module config: dim=16 -> D = 2*dim = 32; ft_seq_len=8 -> N = 64.
    dim = 16
    pt_seq_len = 16
    ft_seq_len = 8
    B, H = 2, 3
    N, D = ft_seq_len * ft_seq_len, 2 * dim

    freqs_cos, freqs_sin = make_rope_buffers(dim, pt_seq_len, ft_seq_len)

    key = jax.random.PRNGKey(0)
    t = jax.random.normal(key, (B, H, N, D), dtype=jnp.float32)

    out = vision_rotary_embedding_fast(t, freqs_cos, freqs_sin)
    out = jax.block_until_ready(out)

    ref = _forward_ref(t, freqs_cos, freqs_sin)
    np.testing.assert_allclose(np.asarray(out), np.asarray(ref), rtol=1e-5, atol=1e-5)

    print("KERNEL_OK")
</pallas_src>

<mosaic_0001>
module attributes {stable_mosaic.version = 11 : i64} {
  func.func @rope_kernel(%arg0: i32, %arg1: memref<6x16x128xf32, #tpu.memory_space<vmem>>, %arg2: memref<16x128xf32, #tpu.memory_space<vmem>>, %arg3: memref<16x128xf32, #tpu.memory_space<vmem>>, %arg4: memref<16x128xf32, #tpu.memory_space<vmem>>, %arg5: memref<6x16x128xf32, #tpu.memory_space<vmem>>) attributes {dimension_semantics = [#tpu.dimension_semantics<parallel>], iteration_bounds = array<i64: 1>, scalar_prefetch = 0 : i64, scratch_operands = 0 : i64, tpu.core_type = #tpu.core_type<tc>, window_params = [{transform_indices = @transform_0, window_bounds = array<i64: 6, 16, 128>}, {pipeline_mode = #tpu.pipeline_mode<synchronous>, transform_indices = @transform_1, window_bounds = array<i64: 16, 128>}, {pipeline_mode = #tpu.pipeline_mode<synchronous>, transform_indices = @transform_2, window_bounds = array<i64: 16, 128>}, {pipeline_mode = #tpu.pipeline_mode<synchronous>, transform_indices = @transform_3, window_bounds = array<i64: 16, 128>}, {transform_indices = @transform_4, window_bounds = array<i64: 6, 16, 128>}]} {
    %c0 = arith.constant 0 : index
    %c0_0 = arith.constant 0 : index
    %c0_1 = arith.constant 0 : index
    %0 = vector.load %arg1[%c0, %c0_0, %c0_1] : memref<6x16x128xf32, #tpu.memory_space<vmem>>, vector<6x16x128xf32>
    %1 = vector.shape_cast %0 : vector<6x16x128xf32> to vector<96x128xf32>
    %c127_i32 = arith.constant 127 : i32
    %2 = tpu.dynamic_rotate %1 by %c127_i32 dim 1 : vector<96x128xf32>, i32 -> vector<96x128xf32>
    %3 = vector.shape_cast %2 : vector<96x128xf32> to vector<6x16x128xf32>
    %c1_i32 = arith.constant 1 : i32
    %4 = tpu.dynamic_rotate %1 by %c1_i32 dim 1 : vector<96x128xf32>, i32 -> vector<96x128xf32>
    %5 = vector.shape_cast %4 : vector<96x128xf32> to vector<6x16x128xf32>
    %c0_2 = arith.constant 0 : index
    %c0_3 = arith.constant 0 : index
    %6 = vector.load %arg2[%c0_2, %c0_3] : memref<16x128xf32, #tpu.memory_space<vmem>>, vector<16x128xf32>
    %7 = vector.shape_cast %6 : vector<16x128xf32> to vector<1x16x128xf32>
    %c0_4 = arith.constant 0 : index
    %c0_5 = arith.constant 0 : index
    %8 = vector.load %arg3[%c0_4, %c0_5] : memref<16x128xf32, #tpu.memory_space<vmem>>, vector<16x128xf32>
    %9 = vector.shape_cast %8 : vector<16x128xf32> to vector<1x16x128xf32>
    %c0_6 = arith.constant 0 : index
    %c0_7 = arith.constant 0 : index
    %10 = vector.load %arg4[%c0_6, %c0_7] : memref<16x128xf32, #tpu.memory_space<vmem>>, vector<16x128xf32>
    %11 = vector.shape_cast %10 : vector<16x128xf32> to vector<1x16x128xf32>
    %12 = vector.broadcast %7 : vector<1x16x128xf32> to vector<6x16x128xf32>
    %13 = arith.mulf %0, %12 : vector<6x16x128xf32>
    %14 = vector.broadcast %9 : vector<1x16x128xf32> to vector<6x16x128xf32>
    %15 = arith.mulf %3, %14 : vector<6x16x128xf32>
    %16 = arith.addf %13, %15 : vector<6x16x128xf32>
    %17 = vector.broadcast %11 : vector<1x16x128xf32> to vector<6x16x128xf32>
    %18 = arith.mulf %5, %17 : vector<6x16x128xf32>
    %19 = arith.addf %16, %18 : vector<6x16x128xf32>
    %c0_8 = arith.constant 0 : index
    %c0_9 = arith.constant 0 : index
    %c0_10 = arith.constant 0 : index
    %20 = vector.load %arg5[%c0_8, %c0_9, %c0_10] : memref<6x16x128xf32, #tpu.memory_space<vmem>>, vector<6x16x128xf32>
    tpu.vector_store %arg5[%c0_8, %c0_9, %c0_10], %19 {strides = array<i32>} : memref<6x16x128xf32, #tpu.memory_space<vmem>>, vector<6x16x128xf32>,
    return
  }
  func.func @transform_0(%arg0: i32) -> (i32, i32, i32) {
    %c0_i32 = arith.constant 0 : i32
    %c0_i32_0 = arith.constant 0 : i32
    %c0_i32_1 = arith.constant 0 : i32
    return %arg0, %c0_i32, %c0_i32_0 : i32, i32, i32
  }
  func.func @transform_1(%arg0: i32) -> (i32, i32) {
    %c0_i32 = arith.constant 0 : i32
    %c0_i32_0 = arith.constant 0 : i32
    %c0_i32_1 = arith.constant 0 : i32
    return %c0_i32, %c0_i32_0 : i32, i32
  }
  func.func @transform_2(%arg0: i32) -> (i32, i32) {
    %c0_i32 = arith.constant 0 : i32
    %c0_i32_0 = arith.constant 0 : i32
    %c0_i32_1 = arith.constant 0 : i32
    return %c0_i32, %c0_i32_0 : i32, i32
  }
  func.func @transform_3(%arg0: i32) -> (i32, i32) {
    %c0_i32 = arith.constant 0 : i32
    %c0_i32_0 = arith.constant 0 : i32
    %c0_i32_1 = arith.constant 0 : i32
    return %c0_i32, %c0_i32_0 : i32, i32
  }
  func.func @transform_4(%arg0: i32) -> (i32, i32, i32) {
    %c0_i32 = arith.constant 0 : i32
    %c0_i32_0 = arith.constant 0 : i32
    %c0_i32_1 = arith.constant 0 : i32
    return %arg0, %c0_i32, %c0_i32_0 : i32, i32, i32
  }
}

</mosaic_0001>

<bundles_post_ra>
// kernel: tpu_custom_call.1
= control target key start
LH: loop header
LB: loop body
LE: loop exit
PB: predicated region body
PF: predicated region fallthrough
CT: control target
= control target key end

     0   :  { %9 = vsyncpa [#allocation3], 0  ;;  %s574_s0 = inlined_call_operand.hbm [shape: f32[6,16,128], index: 0, kind: input, shape index: {}]   ;;  %s575_s1 = inlined_call_operand.hbm [shape: f32[16,128], index: 1, kind: input, shape index: {}]   ;;  %s576_s2 = inlined_call_operand.hbm [shape: f32[16,128], index: 2, kind: input, shape index: {}]   ;;  %s577_s3 = inlined_call_operand.hbm [shape: f32[16,128], index: 3, kind: input, shape index: {}]   ;;  %s578_s4 = inlined_call_operand.hbm [shape: f32[6,16,128], index: 4, kind: output, shape index: {}]  }
   0x1   :  { %10 = vsyncpa [#allocation6], 0 }
   0x2   :  { %11 = vsyncpa [#allocation9], 0 }
   0x3   :  { %12 = vsyncpa [#allocation4], 0  ;;  %s357_s15 = smov [#allocation5]   ;;  %s358_s17 = smov [#allocation2]  }
   0x4   :  { %s30_s16 = sshll.u32 %s357_s15, 4  ;;  %s18_s18 = sshll.u32 %s358_s17, 4  ;;  %s31_s16 = int_to_ptr.vmem [resolvable:$true] %s30_s16  ;;  %s391_s18 = int_to_ptr.vmem [resolvable:$true] %s18_s18 }
   0x5   :  { %s239_s21 = scalar_lea.hbm %s575_s1, 256 }
   0x6   :  { %p240_p0 = scmp.ne.s32.totalorder %s575_s1, %s239_s21  ;;  %p243_p1 = scmp.lt.u32.totalorder %s239_s21, %s575_s1 }
   0x8   :  { %p245_p2 = pnand %p243_p1, %p240_p0 }
   0xa   :  { %248 = shalt.err (!%p245_p2)
}
   0xb   :  { %s249_s26 = scalar_lea.vmem %s31_s16, 256  ;;  %p254_p4 = scmp.lt.s32.totalorder %s31_s16, %s31_s16 }
   0xc   :  { %p250_p3 = scmp.ne.s32.totalorder %s31_s16, %s249_s26  ;;  %p255_p5 = scmp.lt.s32.totalorder %s249_s26, %s249_s26 }
   0xe   :  { %p256_p6 = por %p255_p5, %p254_p4 }
  0x10   :  { %p257_p7 = pnand %p256_p6, %p250_p3 }
  0x12   :  { %260 = shalt.err (!%p257_p7)
}
  0x13   :  { %s359_s27 = smov 128   ;;  %s360_s28 = smov 8  }
  0x14   :  { %36 = dma.hbm_to_vmem [thread:$0]  %s575_s1, 256, %s31_s16, [#allocation6], %s359_s27, %s359_s27, %s360_s28  }
  0x15   :  { %s261_s7 = scalar_lea.hbm %s574_s0, 1536 }
  0x16   :  { %p262_p8 = scmp.ne.s32.totalorder %s574_s0, %s261_s7  ;;  %p265_p9 = scmp.lt.u32.totalorder %s261_s7, %s574_s0 }
  0x18   :  { %p267_p10 = pnand %p265_p9, %p262_p8 }
  0x1a   :  { %270 = shalt.err (!%p267_p10)
}
  0x1b   :  { %s271_s12 = scalar_lea.vmem %s391_s18, 1536  ;;  %p276_p12 = scmp.lt.s32.totalorder %s391_s18, %s391_s18 }
  0x1c   :  { %p272_p11 = scmp.ne.s32.totalorder %s391_s18, %s271_s12  ;;  %p277_p13 = scmp.lt.s32.totalorder %s271_s12, %s271_s12 }
  0x1e   :  { %p278_p0 = por %p277_p13, %p276_p12 }
  0x20   :  { %p279_p1 = pnand %p278_p0, %p272_p11 }
  0x22   :  { %282 = shalt.err (!%p279_p1)
}
  0x23   :  { %24 = dma.hbm_to_vmem [thread:$0]  %s574_s0, 1536, %s391_s18, [#allocation3], %s359_s27, %s359_s27, %s360_s28  }
  0x24   :  { %s361_s14 = smov [#allocation7]   ;;  %s362_s16 = smov [#allocation8]  }
  0x25   :  { %s42_s15 = sshll.u32 %s361_s14, 4  ;;  %s54_s17 = sshll.u32 %s362_s16, 4  ;;  %s43_s15 = int_to_ptr.vmem [resolvable:$true] %s42_s15  ;;  %s428_s17 = int_to_ptr.vmem [resolvable:$true] %s54_s17 }
  0x26   :  { %s283_s21 = scalar_lea.hbm %s576_s2, 256 }
  0x27   :  { %p284_p2 = scmp.ne.s32.totalorder %s576_s2, %s283_s21  ;;  %p287_p3 = scmp.lt.u32.totalorder %s283_s21, %s576_s2 }
  0x29   :  { %p289_p4 = pnand %p287_p3, %p284_p2 }
  0x2b   :  { %292 = shalt.err (!%p289_p4)
}
  0x2c   :  { %s293_s0 = scalar_lea.vmem %s43_s15, 256  ;;  %p298_p6 = scmp.lt.s32.totalorder %s43_s15, %s43_s15 }
  0x2d   :  { %p294_p5 = scmp.ne.s32.totalorder %s43_s15, %s293_s0  ;;  %p299_p7 = scmp.lt.s32.totalorder %s293_s0, %s293_s0 }
  0x2f   :  { %p300_p8 = por %p299_p7, %p298_p6 }
  0x31   :  { %p301_p9 = pnand %p300_p8, %p294_p5 }
  0x33   :  { %304 = shalt.err (!%p301_p9)
}
  0x34   :  { %48 = dma.hbm_to_vmem [thread:$0]  %s576_s2, 256, %s43_s15, [#allocation6], %s359_s27, %s359_s27, %s360_s28  }
  0x35   :  { %s305_s5 = scalar_lea.hbm %s577_s3, 256 }
  0x36   :  { %p306_p10 = scmp.ne.s32.totalorder %s577_s3, %s305_s5  ;;  %p309_p11 = scmp.lt.u32.totalorder %s305_s5, %s577_s3 }
  0x38   :  { %p311_p12 = pnand %p309_p11, %p306_p10 }
  0x3a   :  { %314 = shalt.err (!%p311_p12)
}
  0x3b   :  { %s315_s10 = scalar_lea.vmem %s428_s17, 256  ;;  %p320_p0 = scmp.lt.s32.totalorder %s428_s17, %s428_s17 }
  0x3c   :  { %p316_p13 = scmp.ne.s32.totalorder %s428_s17, %s315_s10  ;;  %p321_p1 = scmp.lt.s32.totalorder %s315_s10, %s315_s10 }
  0x3e   :  { %p322_p2 = por %p321_p1, %p320_p0 }
  0x40   :  { %p323_p3 = pnand %p322_p2, %p316_p13 }
  0x42   :  { %326 = shalt.err (!%p323_p3)
}
  0x43   :  { %60 = dma.hbm_to_vmem [thread:$0]  %s577_s3, 256, %s428_s17, [#allocation9], %s359_s27, %s359_s27, %s360_s28  }
  0x44   :  { %349 = dma.done.wait [#allocation3], 1536  }
  0x45   :  { %350 = vsyncadd [#allocation3], 4294965760 }
  0x46   :  { %351 = dma.done.wait [#allocation6], 512  }
  0x47   :  { %352 = vsyncadd [#allocation6], 4294966784 }
  0x48   :  { %353 = dma.done.wait [#allocation9], 256  }
  0x49   :  { %354 = vsyncadd [#allocation9], 4294967040  ;;  %v75_v0 = vld [vmem:[#allocation2 + $0x10] sm:$0xff]  ;;  %v73_v1 = vld [vmem:[#allocation2] sm:$0xff]  ;;  %s363_s12 = smov 127   ;;  %s364_s3 = smov 1  }
  0x4a   :  { %89 = vrot.lane.b32.xlu1 %v75_v0, %s363_s12  ;;  %85 = vrot.lane.b32.xlu0 %v73_v1, %s363_s12  ;;  %v76_v2 = vld [vmem:[#allocation2 + $0x18] sm:$0xff]  ;;  %v74_v3 = vld [vmem:[#allocation2 + $0x8] sm:$0xff]  ;;  %v467_v5 = vld [vmem:[#allocation2 + $0x20] sm:$0xff]  ;;  %s365_s1 = smov [#allocation10]  }
  0x4b   :  { %v465_v4 = vld [vmem:[#allocation2 + $0x28] sm:$0xff]  ;;  %v471_v6 = vld [vmem:[#allocation2 + $0x38] sm:$0xff]  ;;  %v473_v7 = vld [vmem:[#allocation2 + $0x30] sm:$0xff]  ;;  %s216_s13 = sshll.u32 %s365_s1, 4  ;;  %s217_s13 = int_to_ptr.vmem [resolvable:$true] %s216_s13 }
  0x4c   :  { %v477_v8 = vld [vmem:[#allocation2 + $0x48] sm:$0xff]  ;;  %v479_v9 = vld [vmem:[#allocation2 + $0x40] sm:$0xff]  ;;  %v483_v10 = vld [vmem:[#allocation2 + $0x58] sm:$0xff]  ;;  %s327_s14 = scalar_lea.vmem %s217_s13, 1536  ;;  %p332_p5 = scmp.lt.s32.totalorder %s217_s13, %s217_s13 }
  0x4d   :  { %v485_v11 = vld [vmem:[#allocation2 + $0x50] sm:$0xff]  ;;  %v497_v22 = vld [vmem:[#allocation5] sm:$0xff]  ;;  %v501_v24 = vld [vmem:[#allocation5 + $0x8] sm:$0xff]  ;;  %p328_p4 = scmp.ne.s32.totalorder %s217_s13, %s327_s14  ;;  %p333_p6 = scmp.lt.s32.totalorder %s327_s14, %s327_s14 }
  0x4e   :  { %91 = vrot.lane.b32.xlu1 %v76_v2, %s363_s12  ;;  %87 = vrot.lane.b32.xlu0 %v74_v3, %s363_s12  ;;  %v499_v23 = vld [vmem:[#allocation7] sm:$0xff]  ;;  %v503_v25 = vld [vmem:[#allocation7 + $0x8] sm:$0xff]  ;;  %v139_v26 = vmul.f32 %v497_v22, %v73_v1  ;;  %v140_v30 = vmul.f32 %v501_v24, %v74_v3  ;;  %v513_v32 = vld [vmem:[#allocation8 + $0x8] sm:$0xff]  ;;  %v141_v34 = vmul.f32 %v497_v22, %v75_v0 }
  0x4f   :  { %v515_v33 = vld [vmem:[#allocation8] sm:$0xff]  ;;  %v142_v35 = vmul.f32 %v501_v24, %v76_v2  ;;  %v144_v46 = vmul.f32 %v501_v24, %v465_v4  ;;  %v143_v47 = vmul.f32 %v497_v22, %v467_v5  ;;  %v146_v58 = vmul.f32 %v501_v24, %v471_v6  ;;  %p334_p7 = por %p333_p6, %p332_p5 }
  0x50   :  { %v145_v59 = vmul.f32 %v497_v22, %v473_v7 }
  0x51   :  { %p335_p8 = pnand %p334_p7, %p328_p4 }
  0x52   :  { %95 = vrot.lane.b32.xlu1 %v465_v4, %s363_s12  ;;  %93 = vrot.lane.b32.xlu0 %v467_v5, %s363_s12 }
  0x56   :  { %99 = vrot.lane.b32.xlu1 %v471_v6, %s363_s12  ;;  %97 = vrot.lane.b32.xlu0 %v473_v7, %s363_s12 }
  0x5a   :  { %103 = vrot.lane.b32.xlu1 %v477_v8, %s363_s12  ;;  %101 = vrot.lane.b32.xlu0 %v479_v9, %s363_s12 }
  0x5e   :  { %107 = vrot.lane.b32.xlu1 %v483_v10, %s363_s12  ;;  %105 = vrot.lane.b32.xlu0 %v485_v11, %s363_s12 }
  0x62   :  { %111 = vrot.lane.b32.xlu1 %v74_v3, %s364_s3  ;;  %109 = vrot.lane.b32.xlu0 %v73_v1, %s364_s3 }
  0x66   :  { %115 = vrot.lane.b32.xlu1 %v76_v2, %s364_s3  ;;  %113 = vrot.lane.b32.xlu0 %v75_v0, %s364_s3 }
  0x6a   :  { %119 = vrot.lane.b32.xlu1 %v465_v4, %s364_s3  ;;  %117 = vrot.lane.b32.xlu0 %v467_v5, %s364_s3 }
  0x6e   :  { %123 = vrot.lane.b32.xlu1 %v471_v6, %s364_s3  ;;  %121 = vrot.lane.b32.xlu0 %v473_v7, %s364_s3  ;;  %v148_v6 = vmul.f32 %v501_v24, %v477_v8  ;;  %v147_v7 = vmul.f32 %v497_v22, %v479_v9 }
  0x72   :  { %127 = vrot.lane.b32.xlu1 %v477_v8, %s364_s3  ;;  %125 = vrot.lane.b32.xlu0 %v479_v9, %s364_s3  ;;  %v150_v8 = vmul.f32 %v501_v24, %v483_v10  ;;  %v149_v9 = vmul.f32 %v497_v22, %v485_v11 }
  0x76   :  { %131 = vrot.lane.b32.xlu1 %v483_v10, %s364_s3  ;;  %129 = vrot.lane.b32.xlu0 %v485_v11, %s364_s3 }
  0xbc   :  { %v90_v12 = vpop.permute.xlu1 %89  ;;  %v86_v13 = vpop.permute.xlu0 %85 }
  0xbd   :  { %v151_v27 = vmul.f32 %v499_v23, %v86_v13  ;;  %v153_v36 = vmul.f32 %v499_v23, %v90_v12 }
  0xbf   :  { %v163_v37 = vadd.f32 %v151_v27, %v139_v26  ;;  %v165_v52 = vadd.f32 %v153_v36, %v141_v34 }
  0xc0   :  { %v92_v14 = vpop.permute.xlu1 %91  ;;  %v88_v15 = vpop.permute.xlu0 %87 }
  0xc1   :  { %v152_v31 = vmul.f32 %v503_v25, %v88_v15  ;;  %v154_v40 = vmul.f32 %v503_v25, %v92_v14 }
  0xc3   :  { %v164_v41 = vadd.f32 %v152_v31, %v140_v30  ;;  %v166_v53 = vadd.f32 %v154_v40, %v142_v35 }
  0xc4   :  { %v96_v16 = vpop.permute.xlu1 %95  ;;  %v94_v17 = vpop.permute.xlu0 %93 }
  0xc5   :  { %v156_v48 = vmul.f32 %v503_v25, %v96_v16  ;;  %v155_v49 = vmul.f32 %v499_v23, %v94_v17 }
  0xc7   :  { %v168_v60 = vadd.f32 %v156_v48, %v144_v46  ;;  %v167_v61 = vadd.f32 %v155_v49, %v143_v47 }
  0xc8   :  { %v100_v18 = vpop.permute.xlu1 %99  ;;  %v98_v19 = vpop.permute.xlu0 %97 }
  0xc9   :  { %v158_v0 = vmul.f32 %v503_v25, %v100_v18  ;;  %v157_v1 = vmul.f32 %v499_v23, %v98_v19 }
  0xcb   :  { %v170_v16 = vadd.f32 %v158_v0, %v146_v58  ;;  %v169_v17 = vadd.f32 %v157_v1, %v145_v59 }
  0xcc   :  { %v104_v20 = vpop.permute.xlu1 %103  ;;  %v102_v21 = vpop.permute.xlu0 %101 }
  0xcd   :  { %v160_v12 = vmul.f32 %v503_v25, %v104_v20  ;;  %v159_v13 = vmul.f32 %v499_v23, %v102_v21 }
  0xcf   :  { %v172_v20 = vadd.f32 %v160_v12, %v148_v6  ;;  %v171_v21 = vadd.f32 %v159_v13, %v147_v7 }
  0xd0   :  { %v507_v28 = vpop.permute.xlu1 %107  ;;  %v509_v29 = vpop.permute.xlu0 %105 }
  0xd1   :  { %v162_v34 = vmul.f32 %v503_v25, %v507_v28  ;;  %v161_v35 = vmul.f32 %v499_v23, %v509_v29 }
  0xd3   :  { %v174_v22 = vadd.f32 %v162_v34, %v150_v8 }
  0xd4   :  { %v112_v38 = vpop.permute.xlu1 %111  ;;  %v110_v39 = vpop.permute.xlu0 %109 }
  0xd5   :  { %v176_v42 = vmul.f32 %v513_v32, %v112_v38  ;;  %v175_v43 = vmul.f32 %v515_v33, %v110_v39  ;;  %v173_v39 = vadd.f32 %v161_v35, %v149_v9 }
  0xd7   :  { %v188_v44 = vadd.f32 %v176_v42, %v164_v41  ;;  %v187_v45 = vadd.f32 %v175_v43, %v163_v37 }
  0xd8   :  { %v116_v50 = vpop.permute.xlu1 %115  ;;  %v114_v51 = vpop.permute.xlu0 %113 }
  0xd9   :  { %200 = vst [vmem:[#allocation10 + $0x8] sm:$0xff] %v188_v44  ;;  %199 = vst [vmem:[#allocation10] sm:$0xff] %v187_v45  ;;  %v178_v54 = vmul.f32 %v513_v32, %v116_v50  ;;  %v177_v55 = vmul.f32 %v515_v33, %v114_v51 }
  0xdb   :  { %v190_v56 = vadd.f32 %v178_v54, %v166_v53  ;;  %v189_v57 = vadd.f32 %v177_v55, %v165_v52 }
  0xdc   :  { %v120_v62 = vpop.permute.xlu1 %119  ;;  %v118_v63 = vpop.permute.xlu0 %117 }
  0xdd   :  { %202 = vst [vmem:[#allocation10 + $0x18] sm:$0xff] %v190_v56  ;;  %201 = vst [vmem:[#allocation10 + $0x10] sm:$0xff] %v189_v57  ;;  %v180_v2 = vmul.f32 %v513_v32, %v120_v62  ;;  %v179_v3 = vmul.f32 %v515_v33, %v118_v63 }
  0xdf   :  { %v192_v4 = vadd.f32 %v180_v2, %v168_v60  ;;  %v191_v5 = vadd.f32 %v179_v3, %v167_v61 }
  0xe0   :  { %v124_v14 = vpop.permute.xlu1 %123  ;;  %v122_v15 = vpop.permute.xlu0 %121 }
  0xe1   :  { %204 = vst [vmem:[#allocation10 + $0x28] sm:$0xff] %v192_v4  ;;  %203 = vst [vmem:[#allocation10 + $0x20] sm:$0xff] %v191_v5  ;;  %v182_v18 = vmul.f32 %v513_v32, %v124_v14  ;;  %v181_v19 = vmul.f32 %v515_v33, %v122_v15 }
  0xe3   :  { %v194_v26 = vadd.f32 %v182_v18, %v170_v16  ;;  %v193_v27 = vadd.f32 %v181_v19, %v169_v17 }
  0xe4   :  { %v128_v30 = vpop.permute.xlu1 %127  ;;  %v126_v31 = vpop.permute.xlu0 %125 }
  0xe5   :  { %206 = vst [vmem:[#allocation10 + $0x38] sm:$0xff] %v194_v26  ;;  %205 = vst [vmem:[#allocation10 + $0x30] sm:$0xff] %v193_v27  ;;  %v184_v36 = vmul.f32 %v513_v32, %v128_v30  ;;  %v183_v37 = vmul.f32 %v515_v33, %v126_v31 }
  0xe7   :  { %v196_v10 = vadd.f32 %v184_v36, %v172_v20  ;;  %v195_v24 = vadd.f32 %v183_v37, %v171_v21 }
  0xe8   :  { %v132_v38 = vpop.permute.xlu1 %131  ;;  %v130_v11 = vpop.permute.xlu0 %129 }
  0xe9   :  { %208 = vst [vmem:[#allocation10 + $0x48] sm:$0xff] %v196_v10  ;;  %207 = vst [vmem:[#allocation10 + $0x40] sm:$0xff] %v195_v24  ;;  %v186_v25 = vmul.f32 %v513_v32, %v132_v38  ;;  %v185_v23 = vmul.f32 %v515_v33, %v130_v11 }
  0xeb   :  { %v198_v28 = vadd.f32 %v186_v25, %v174_v22  ;;  %v197_v29 = vadd.f32 %v185_v23, %v173_v39 }
  0xed   :  { %210 = vst [vmem:[#allocation10 + $0x58] sm:$0xff] %v198_v28  ;;  %209 = vst [vmem:[#allocation10 + $0x50] sm:$0xff] %v197_v29 }
  0xee   :  { %338 = shalt.err (!%p335_p8)
}
  0xef   :  { %s339_s17 = scalar_lea.hbm %s578_s4, 1536 }
  0xf0   :  { %p340_p9 = scmp.ne.s32.totalorder %s578_s4, %s339_s17  ;;  %p343_p10 = scmp.lt.u32.totalorder %s339_s17, %s578_s4 }
  0xf2   :  { %p345_p11 = pnand %p343_p10, %p340_p9 }
  0xf4   :  { %348 = shalt.err (!%p345_p11)
}
  0xf5   :  { %222 = dma.vmem_to_hbm [thread:$0]  %s217_s13, 1536, %s578_s4, [#allocation4], %s359_s27, %s359_s27, %s360_s28  }
  0xf6   :  { %355 = dma.done.wait [#allocation4], 1536  }
  0xf7   :  { %356 = vsyncadd [#allocation4], 4294965760 }
  0xf8   :  { %226 = vsyncpa [#allocation3], 1 }
  0xf9   :  { %227 = vsyncpa [#allocation6], 1 }
  0xfa   :  { %228 = vsyncpa [#allocation9], 1 }
  0xfb   :  { %229 = vsyncpa [#allocation4], 1 }

</bundles_post_ra>
